<compile_context>
chip_gen: v7x
topology: tpu7x:2x2x1
jax: 0.10.0
libtpu: 0.0.40
codegen_flags: <defaults>
</compile_context>

<pallas_src>
import functools

import jax
import jax.numpy as jnp
from jax.experimental import pallas as pl
from jax.experimental.pallas import tpu as pltpu

HID_SIZE = 64
LANE = 128          # TPU lane width; pad feature dims up to this
SUBLANE_BF16 = 16   # bf16 packed sublane group (one packed vreg is 16x128)

# Weights/biases use a constant index_map, so Pallas only re-DMAs them when the
# block index changes (never) -- the second pipeline buffer is ~100 KiB of idle
# VMEM and the default small-batch path is grid=(1,) where buffering is moot.
# Flip this to request single-buffering (pl.Buffered(1)) on jax versions where
# BlockSpec.pipeline_mode is honored by the TPU pallas_call lowering.
_USE_SINGLE_BUFFERED_WEIGHTS = False


def _round_up(n: int, m: int) -> int:
    return (n + m - 1) // m * m


def _supports_bf16_elementwise() -> bool:
    """bf16 VPU/EUP exists on v6e (Trillium) / v7x; not on v5e and older."""
    try:
        kind = jax.devices()[0].device_kind.lower()
    except Exception:
        return False
    return any(tag in kind for tag in ("v6", "v7", "7x", "trillium", "ironwood"))


def _const_spec(shape):
    """BlockSpec for a grid-invariant (VMEM-resident) operand."""
    if _USE_SINGLE_BUFFERED_WEIGHTS:
        return pl.BlockSpec(shape, lambda i: (0, 0), pipeline_mode=pl.Buffered(1))
    return pl.BlockSpec(shape, lambda i: (0, 0))


# --------------------------------------------------------------------------
# Kernel
# --------------------------------------------------------------------------
def _actor_kernel(x_ref, w1_ref, b1_ref, w2_ref, b2_ref, w3_ref, b3_ref, o_ref,
                  *, act_dtype):
    """Fused 3-layer tanh MLP on one (TB, 128) batch tile.

    act_dtype: dtype used for bias-add downcast + tanh (bf16 on v6e/v7x where
    the VPU/EUP support it; f32 on v5e).  MXU operands are bf16, accumulation
    is always f32.
    """
    x = x_ref[...]  # bf16 (TB, obs_p)

    # Layer 1
    a1 = jnp.dot(x, w1_ref[...], preferred_element_type=jnp.float32) + b1_ref[...]
    h1 = jnp.tanh(a1.astype(act_dtype)).astype(jnp.bfloat16)  # no-op cast if bf16

    # Layer 2
    a2 = jnp.dot(h1, w2_ref[...], preferred_element_type=jnp.float32) + b2_ref[...]
    h2 = jnp.tanh(a2.astype(act_dtype)).astype(jnp.bfloat16)

    # Layer 3 (output head)
    a3 = jnp.dot(h2, w3_ref[...], preferred_element_type=jnp.float32) + b3_ref[...]
    o_ref[...] = jnp.tanh(a3.astype(act_dtype)).astype(o_ref.dtype)


# --------------------------------------------------------------------------
# Host-side wrappers
# --------------------------------------------------------------------------
def prepare_params(params):
    """Pad + cast the actor parameters ONCE (hoisted out of the forward pass).

    params: dict of f32 arrays, weights stored as (in, out) = PyTorch W.T.
    Returns a dict of padded device arrays reusable across every forward call.
    """
    w1, b1 = params["w1"], params["b1"]
    w2, b2 = params["w2"], params["b2"]
    w3, b3 = params["w3"], params["b3"]

    obs, hid = w1.shape
    act = w3.shape[1]
    obs_p, hid_p, act_p = (_round_up(n, LANE) for n in (obs, hid, act))

    bf16, f32 = jnp.bfloat16, jnp.float32
    prepared = {
        "w1p": jnp.zeros((obs_p, hid_p), bf16).at[:obs, :hid].set(w1.astype(bf16)),
        "w2p": jnp.zeros((hid_p, hid_p), bf16).at[:hid, :hid].set(w2.astype(bf16)),
        "w3p": jnp.zeros((hid_p, act_p), bf16).at[:hid, :act].set(w3.astype(bf16)),
        "b1p": jnp.zeros((1, hid_p), f32).at[:, :hid].set(b1.reshape(1, -1)),
        "b2p": jnp.zeros((1, hid_p), f32).at[:, :hid].set(b2.reshape(1, -1)),
        "b3p": jnp.zeros((1, act_p), f32).at[:, :act].set(b3.reshape(1, -1)),
        "dims": (obs, hid, act),
        "pdims": (obs_p, hid_p, act_p),
    }
    return prepared


def model_actor_forward(x, params, *,
                        block_b: int = 512,
                        single_tile_rows: int = 1024,
                        out_dtype=jnp.float32,
                        unpad: bool = True,
                        bf16_activations=None):
    """Actor forward.  x: (B, obs_size) f32.

    params: output of prepare_params() (preferred; prepare once and reuse), or
    the raw param dict (padding then happens per call).
    """
    prepared = params if "w1p" in params else prepare_params(params)
    obs, hid, act = prepared["dims"]
    obs_p, hid_p, act_p = prepared["pdims"]
    w1p, b1p = prepared["w1p"], prepared["b1p"]
    w2p, b2p = prepared["w2p"], prepared["b2p"]
    w3p, b3p = prepared["w3p"], prepared["b3p"]

    B, obs_in = x.shape
    assert obs_in == obs, (obs_in, obs)

    # --- batch tiling -----------------------------------------------------
    # Small/medium batch: one tile, grid=(1,) -- no pipelining, no duplicated
    # weight DMA, no per-step overhead.  Large rollout batch: big tiles
    # (block_b rows) and a parallel grid so v7x can split across both TCs.
    b_min = _round_up(B, SUBLANE_BF16)
    if b_min <= single_tile_rows:
        tb = b_min
    else:
        tb = _round_up(min(block_b, b_min), SUBLANE_BF16)
    b_p = _round_up(B, tb)
    grid = (b_p // tb,)

    # --- activation dtype (generation-dependent) ---------------------------
    if bf16_activations is None:
        bf16_activations = _supports_bf16_elementwise()
    act_dtype = jnp.bfloat16 if bf16_activations else jnp.float32

    # --- per-call input prep (only x; weights are pre-padded) --------------
    xp = jnp.zeros((b_p, obs_p), jnp.bfloat16).at[:B, :obs].set(
        x.astype(jnp.bfloat16))

    kernel = functools.partial(_actor_kernel, act_dtype=act_dtype)

    # Advisory cost estimate so XLA schedules this tiny call well.
    flops = 2 * b_p * (obs_p * hid_p + hid_p * hid_p + hid_p * act_p)
    transcendentals = b_p * (hid_p + hid_p + act_p)
    bytes_accessed = int(
        xp.size * xp.dtype.itemsize
        + sum(a.size * a.dtype.itemsize for a in (w1p, b1p, w2p, b2p, w3p, b3p))
        + b_p * act_p * jnp.dtype(out_dtype).itemsize)

    out_p = pl.pallas_call(
        kernel,
        out_shape=jax.ShapeDtypeStruct((b_p, act_p), out_dtype),
        grid=grid,
        in_specs=[
            pl.BlockSpec((tb, obs_p), lambda i: (i, 0)),   # x: streamed per tile
            _const_spec((obs_p, hid_p)), _const_spec((1, hid_p)),   # w1, b1
            _const_spec((hid_p, hid_p)), _const_spec((1, hid_p)),   # w2, b2
            _const_spec((hid_p, act_p)), _const_spec((1, act_p)),   # w3, b3
        ],
        out_specs=pl.BlockSpec((tb, act_p), lambda i: (i, 0)),
        compiler_params=pltpu.CompilerParams(
            # Only shard across TensorCores when there is real per-core work.
            dimension_semantics=("parallel",) if grid[0] > 1 else ("arbitrary",),
        ),
        cost_estimate=pl.CostEstimate(
            flops=flops,
            transcendentals=transcendentals,
            bytes_accessed=bytes_accessed),
    )(xp, w1p, b1p, w2p, b2p, w3p, b3p)

    if not unpad:
        return out_p                 # lane-dense (b_p, act_p) slab for consumers
    return out_p[:B, :act]


# --------------------------------------------------------------------------
# Test helpers
# --------------------------------------------------------------------------
def init_params(key, obs_size, act_size):
    """Deterministic synthetic init. Weights stored as (in, out) = PyTorch W.T."""
    ks = jax.random.split(key, 6)
    scale = 0.1
    return {
        "w1": scale * jax.random.normal(ks[0], (obs_size, HID_SIZE), jnp.float32),
        "b1": scale * jax.random.normal(ks[1], (HID_SIZE,), jnp.float32),
        "w2": scale * jax.random.normal(ks[2], (HID_SIZE, HID_SIZE), jnp.float32),
        "b2": scale * jax.random.normal(ks[3], (HID_SIZE,), jnp.float32),
        "w3": scale * jax.random.normal(ks[4], (HID_SIZE, act_size), jnp.float32),
        "b3": scale * jax.random.normal(ks[5], (act_size,), jnp.float32),
        # logstd exists in the module but is not used in forward():
        "logstd": jnp.zeros((act_size,), jnp.float32),
    }


def _reference(x, p):
    h1 = jnp.tanh(x @ p["w1"] + p["b1"])
    h2 = jnp.tanh(h1 @ p["w2"] + p["b2"])
    return jnp.tanh(h2 @ p["w3"] + p["b3"])


if __name__ == "__main__":
    key = jax.random.PRNGKey(0)
    kx, kp = jax.random.split(key)

    # HalfCheetah(PyBullet): obs_size=26, act_size=6.
    batch, obs_size, act_size = 256, 26, 6
    x = jax.random.normal(kx, (batch, obs_size), jnp.float32)
    params = init_params(kp, obs_size, act_size)

    # Hoisted padding/cast: done once, reused by every forward call.
    prepped = prepare_params(params)

    # --- primary path: single grid step (B=256 -> grid=(1,)), auto act dtype
    out = jax.block_until_ready(model_actor_forward(x, prepped))
    ref = _reference(x, params)
    assert out.shape == (batch, act_size), out.shape
    # bf16 MXU operands (and bf16 tanh on v6e/v7x) with f32 accumulation.
    assert jnp.allclose(out, ref, atol=2e-2, rtol=2e-2), (
        "mismatch vs reference (single-tile), max abs err = "
        f"{float(jnp.max(jnp.abs(out - ref)))}"
    )

    # --- secondary path: force the multi-tile parallel grid (+ row padding)
    # and the f32 elementwise fallback used on v5e.
    x2 = jax.random.normal(jax.random.PRNGKey(1), (200, obs_size), jnp.float32)
    out2 = jax.block_until_ready(
        model_actor_forward(x2, prepped, block_b=64, single_tile_rows=64,
                            bf16_activations=False))
    ref2 = _reference(x2, params)
    assert out2.shape == (200, act_size), out2.shape
    assert jnp.allclose(out2, ref2, atol=2e-2, rtol=2e-2), (
        "mismatch vs reference (multi-tile), max abs err = "
        f"{float(jnp.max(jnp.abs(out2 - ref2)))}"
    )

    print("KERNEL_OK")
</pallas_src>

<mosaic_0001>
module attributes {stable_mosaic.version = 11 : i64} {
  func.func @_actor_kernel(%arg0: i32, %arg1: memref<256x128xbf16, #tpu.memory_space<vmem>>, %arg2: memref<128x128xbf16, #tpu.memory_space<vmem>>, %arg3: memref<1x128xf32, #tpu.memory_space<vmem>>, %arg4: memref<128x128xbf16, #tpu.memory_space<vmem>>, %arg5: memref<1x128xf32, #tpu.memory_space<vmem>>, %arg6: memref<128x128xbf16, #tpu.memory_space<vmem>>, %arg7: memref<1x128xf32, #tpu.memory_space<vmem>>, %arg8: memref<256x128xf32, #tpu.memory_space<vmem>>) attributes {dimension_semantics = [#tpu.dimension_semantics<arbitrary>], iteration_bounds = array<i64: 1>, scalar_prefetch = 0 : i64, scratch_operands = 0 : i64, tpu.core_type = #tpu.core_type<tc>, window_params = [{transform_indices = @transform_0, window_bounds = array<i64: 256, 128>}, {pipeline_mode = #tpu.pipeline_mode<synchronous>, transform_indices = @transform_1, window_bounds = array<i64: 128, 128>}, {pipeline_mode = #tpu.pipeline_mode<synchronous>, transform_indices = @transform_2, window_bounds = array<i64: 1, 128>}, {pipeline_mode = #tpu.pipeline_mode<synchronous>, transform_indices = @transform_3, window_bounds = array<i64: 128, 128>}, {pipeline_mode = #tpu.pipeline_mode<synchronous>, transform_indices = @transform_4, window_bounds = array<i64: 1, 128>}, {pipeline_mode = #tpu.pipeline_mode<synchronous>, transform_indices = @transform_5, window_bounds = array<i64: 128, 128>}, {pipeline_mode = #tpu.pipeline_mode<synchronous>, transform_indices = @transform_6, window_bounds = array<i64: 1, 128>}, {transform_indices = @transform_7, window_bounds = array<i64: 256, 128>}]} {
    %c0 = arith.constant 0 : index
    %c0_0 = arith.constant 0 : index
    %0 = vector.load %arg1[%c0, %c0_0] : memref<256x128xbf16, #tpu.memory_space<vmem>>, vector<256x128xbf16>
    %c0_1 = arith.constant 0 : index
    %c0_2 = arith.constant 0 : index
    %1 = vector.load %arg2[%c0_1, %c0_2] : memref<128x128xbf16, #tpu.memory_space<vmem>>, vector<128x128xbf16>
    %cst = arith.constant dense<0.000000e+00> : vector<256x128xf32>
    %2 = tpu.matmul %0, %1, %cst {dimension_numbers = #tpu.dot_dimension_numbers<[1], [0], [0], [1], [0, 0, 1, 1], [], []>} : vector<256x128xbf16>, vector<128x128xbf16>, vector<256x128xf32> -> vector<256x128xf32>
    %c0_3 = arith.constant 0 : index
    %c0_4 = arith.constant 0 : index
    %3 = vector.load %arg3[%c0_3, %c0_4] : memref<1x128xf32, #tpu.memory_space<vmem>>, vector<1x128xf32>
    %4 = vector.broadcast %3 : vector<1x128xf32> to vector<256x128xf32>
    %5 = arith.addf %2, %4 : vector<256x128xf32>
    %6 = math.tanh %5 : vector<256x128xf32>
    %7 = arith.truncf %6 : vector<256x128xf32> to vector<256x128xbf16>
    %c0_5 = arith.constant 0 : index
    %c0_6 = arith.constant 0 : index
    %8 = vector.load %arg4[%c0_5, %c0_6] : memref<128x128xbf16, #tpu.memory_space<vmem>>, vector<128x128xbf16>
    %cst_7 = arith.constant dense<0.000000e+00> : vector<256x128xf32>
    %9 = tpu.matmul %7, %8, %cst_7 {dimension_numbers = #tpu.dot_dimension_numbers<[1], [0], [0], [1], [0, 0, 1, 1], [], []>} : vector<256x128xbf16>, vector<128x128xbf16>, vector<256x128xf32> -> vector<256x128xf32>
    %c0_8 = arith.constant 0 : index
    %c0_9 = arith.constant 0 : index
    %10 = vector.load %arg5[%c0_8, %c0_9] : memref<1x128xf32, #tpu.memory_space<vmem>>, vector<1x128xf32>
    %11 = vector.broadcast %10 : vector<1x128xf32> to vector<256x128xf32>
    %12 = arith.addf %9, %11 : vector<256x128xf32>
    %13 = math.tanh %12 : vector<256x128xf32>
    %14 = arith.truncf %13 : vector<256x128xf32> to vector<256x128xbf16>
    %c0_10 = arith.constant 0 : index
    %c0_11 = arith.constant 0 : index
    %15 = vector.load %arg6[%c0_10, %c0_11] : memref<128x128xbf16, #tpu.memory_space<vmem>>, vector<128x128xbf16>
    %cst_12 = arith.constant dense<0.000000e+00> : vector<256x128xf32>
    %16 = tpu.matmul %14, %15, %cst_12 {dimension_numbers = #tpu.dot_dimension_numbers<[1], [0], [0], [1], [0, 0, 1, 1], [], []>} : vector<256x128xbf16>, vector<128x128xbf16>, vector<256x128xf32> -> vector<256x128xf32>
    %c0_13 = arith.constant 0 : index
    %c0_14 = arith.constant 0 : index
    %17 = vector.load %arg7[%c0_13, %c0_14] : memref<1x128xf32, #tpu.memory_space<vmem>>, vector<1x128xf32>
    %18 = vector.broadcast %17 : vector<1x128xf32> to vector<256x128xf32>
    %19 = arith.addf %16, %18 : vector<256x128xf32>
    %20 = math.tanh %19 : vector<256x128xf32>
    %c0_15 = arith.constant 0 : index
    %c0_16 = arith.constant 0 : index
    %21 = vector.load %arg8[%c0_15, %c0_16] : memref<256x128xf32, #tpu.memory_space<vmem>>, vector<256x128xf32>
    tpu.vector_store %arg8[%c0_15, %c0_16], %20 {strides = array<i32>} : memref<256x128xf32, #tpu.memory_space<vmem>>, vector<256x128xf32>,
    return
  }
  func.func @transform_0(%arg0: i32) -> (i32, i32) {
    %c0_i32 = arith.constant 0 : i32
    %c0_i32_0 = arith.constant 0 : i32
    return %arg0, %c0_i32 : i32, i32
  }
  func.func @transform_1(%arg0: i32) -> (i32, i32) {
    %c0_i32 = arith.constant 0 : i32
    %c0_i32_0 = arith.constant 0 : i32
    %c0_i32_1 = arith.constant 0 : i32
    return %c0_i32, %c0_i32_0 : i32, i32
  }
  func.func @transform_2(%arg0: i32) -> (i32, i32) {
    %c0_i32 = arith.constant 0 : i32
    %c0_i32_0 = arith.constant 0 : i32
    %c0_i32_1 = arith.constant 0 : i32
    return %c0_i32, %c0_i32_0 : i32, i32
  }
  func.func @transform_3(%arg0: i32) -> (i32, i32) {
    %c0_i32 = arith.constant 0 : i32
    %c0_i32_0 = arith.constant 0 : i32
    %c0_i32_1 = arith.constant 0 : i32
    return %c0_i32, %c0_i32_0 : i32, i32
  }
  func.func @transform_4(%arg0: i32) -> (i32, i32) {
    %c0_i32 = arith.constant 0 : i32
    %c0_i32_0 = arith.constant 0 : i32
    %c0_i32_1 = arith.constant 0 : i32
    return %c0_i32, %c0_i32_0 : i32, i32
  }
  func.func @transform_5(%arg0: i32) -> (i32, i32) {
    %c0_i32 = arith.constant 0 : i32
    %c0_i32_0 = arith.constant 0 : i32
    %c0_i32_1 = arith.constant 0 : i32
    return %c0_i32, %c0_i32_0 : i32, i32
  }
  func.func @transform_6(%arg0: i32) -> (i32, i32) {
    %c0_i32 = arith.constant 0 : i32
    %c0_i32_0 = arith.constant 0 : i32
    %c0_i32_1 = arith.constant 0 : i32
    return %c0_i32, %c0_i32_0 : i32, i32
  }
  func.func @transform_7(%arg0: i32) -> (i32, i32) {
    %c0_i32 = arith.constant 0 : i32
    %c0_i32_0 = arith.constant 0 : i32
    return %arg0, %c0_i32 : i32, i32
  }
}

</mosaic_0001>

<bundles_post_ra>
// kernel: tpu_custom_call.1
= control target key start
LH: loop header
LB: loop body
LE: loop exit
PB: predicated region body
PF: predicated region fallthrough
CT: control target
= control target key end

     0   :  { %12 = vsyncpa [#allocation3], 0  ;;  %s1987_s0 = inlined_call_operand.hbm [shape: bf16[256,128], index: 0, kind: input, shape index: {}]   ;;  %s1988_s1 = inlined_call_operand.hbm [shape: bf16[128,128], index: 1, kind: input, shape index: {}]   ;;  %s1989_s2 = inlined_call_operand.vmem [shape: f32[1,128], index: 2, kind: input, shape index: {}]   ;;  %s1990_s3 = inlined_call_operand.hbm [shape: bf16[128,128], index: 3, kind: input, shape index: {}]   ;;  %s1991_s4 = inlined_call_operand.vmem [shape: f32[1,128], index: 4, kind: input, shape index: {}]   ;;  %s1992_s5 = inlined_call_operand.hbm [shape: bf16[128,128], index: 5, kind: input, shape index: {}]   ;;  %s1993_s6 = inlined_call_operand.vmem [shape: f32[1,128], index: 6, kind: input, shape index: {}]   ;;  %s1994_s7 = inlined_call_operand.hbm [shape: f32[256,128], index: 7, kind: output, shape index: {}]  }
   0x1   :  { %13 = vsyncpa [#allocation6], 0 }
   0x2   :  { %14 = vsyncpa [#allocation9], 0 }
   0x3   :  { %15 = vsyncpa [#allocation4], 0  ;;  %s1720_s24 = smov [#allocation5]   ;;  %s1721_s26 = smov [#allocation2]  }
   0x4   :  { %s33_s25 = sshll.u32 %s1720_s24, 4  ;;  %s21_s27 = sshll.u32 %s1721_s26, 4  ;;  %s34_s25 = int_to_ptr.vmem [resolvable:$true] %s33_s25  ;;  %s1769_s27 = int_to_ptr.vmem [resolvable:$true] %s21_s27 }
   0x5   :  { %s1602_s30 = scalar_lea.hbm %s1988_s1, 1024 }
   0x6   :  { %p1603_p0 = scmp.ne.s32.totalorder %s1988_s1, %s1602_s30  ;;  %p1606_p1 = scmp.lt.u32.totalorder %s1602_s30, %s1988_s1 }
   0x8   :  { %p1608_p2 = pnand %p1606_p1, %p1603_p0 }
   0xa   :  { %1611 = shalt.err (!%p1608_p2)
}
   0xb   :  { %s1612_s12 = scalar_lea.vmem %s34_s25, 1024  ;;  %p1617_p4 = scmp.lt.s32.totalorder %s34_s25, %s34_s25 }
   0xc   :  { %p1613_p3 = scmp.ne.s32.totalorder %s34_s25, %s1612_s12  ;;  %p1618_p5 = scmp.lt.s32.totalorder %s1612_s12, %s1612_s12 }
   0xe   :  { %p1619_p6 = por %p1618_p5, %p1617_p4 }
  0x10   :  { %p1620_p7 = pnand %p1619_p6, %p1613_p3 }
  0x12   :  { %1623 = shalt.err (!%p1620_p7)
}
  0x13   :  { %s1722_s13 = smov 64   ;;  %s1723_s14 = smov 4  }
  0x14   :  { %39 = dma.hbm_to_vmem [thread:$0]  %s1988_s1, 1024, %s34_s25, [#allocation6], %s1722_s13, %s1722_s13, %s1723_s14  }
  0x15   :  { %s1624_s19 = scalar_lea.hbm %s1987_s0, 2048 }
  0x16   :  { %p1625_p8 = scmp.ne.s32.totalorder %s1987_s0, %s1624_s19  ;;  %p1628_p9 = scmp.lt.u32.totalorder %s1624_s19, %s1987_s0 }
  0x18   :  { %p1630_p10 = pnand %p1628_p9, %p1625_p8 }
  0x1a   :  { %1633 = shalt.err (!%p1630_p10)
}
  0x1b   :  { %s1634_s24 = scalar_lea.vmem %s1769_s27, 2048  ;;  %p1639_p12 = scmp.lt.s32.totalorder %s1769_s27, %s1769_s27 }
  0x1c   :  { %p1635_p11 = scmp.ne.s32.totalorder %s1769_s27, %s1634_s24  ;;  %p1640_p13 = scmp.lt.s32.totalorder %s1634_s24, %s1634_s24 }
  0x1e   :  { %p1641_p0 = por %p1640_p13, %p1639_p12 }
  0x20   :  { %p1642_p1 = pnand %p1641_p0, %p1635_p11 }
  0x22   :  { %1645 = shalt.err (!%p1642_p1)
}
  0x23   :  { %27 = dma.hbm_to_vmem [thread:$0]  %s1987_s0, 2048, %s1769_s27, [#allocation3], %s1722_s13, %s1722_s13, %s1723_s14  }
  0x24   :  { %s1724_s26 = smov [#allocation7]   ;;  %s1725_s29 = smov [#allocation8]  }
  0x25   :  { %s47_s28 = sshll.u32 %s1724_s26, 4  ;;  %s61_s30 = sshll.u32 %s1725_s29, 4  ;;  %s48_s28 = int_to_ptr.vmem [resolvable:$true] %s47_s28  ;;  %s1806_s30 = int_to_ptr.vmem [resolvable:$true] %s61_s30 }
  0x26   :  { %s1646_s10 = scalar_lea.hbm %s1990_s3, 1024 }
  0x27   :  { %p1647_p2 = scmp.ne.s32.totalorder %s1990_s3, %s1646_s10  ;;  %p1650_p3 = scmp.lt.u32.totalorder %s1646_s10, %s1990_s3 }
  0x29   :  { %p1652_p4 = pnand %p1650_p3, %p1647_p2 }
  0x2b   :  { %1655 = shalt.err (!%p1652_p4)
}
  0x2c   :  { %s1656_s0 = scalar_lea.vmem %s48_s28, 1024  ;;  %p1661_p6 = scmp.lt.s32.totalorder %s48_s28, %s48_s28 }
  0x2d   :  { %p1657_p5 = scmp.ne.s32.totalorder %s48_s28, %s1656_s0  ;;  %p1662_p7 = scmp.lt.s32.totalorder %s1656_s0, %s1656_s0 }
  0x2f   :  { %p1663_p8 = por %p1662_p7, %p1661_p6 }
  0x31   :  { %p1664_p9 = pnand %p1663_p8, %p1657_p5 }
  0x33   :  { %1667 = shalt.err (!%p1664_p9)
}
  0x34   :  { %53 = dma.hbm_to_vmem [thread:$0]  %s1990_s3, 1024, %s48_s28, [#allocation6], %s1722_s13, %s1722_s13, %s1723_s14  }
  0x35   :  { %s1668_s20 = scalar_lea.hbm %s1992_s5, 1024 }
  0x36   :  { %p1669_p10 = scmp.ne.s32.totalorder %s1992_s5, %s1668_s20  ;;  %p1672_p11 = scmp.lt.u32.totalorder %s1668_s20, %s1992_s5 }
  0x38   :  { %p1674_p12 = pnand %p1672_p11, %p1669_p10 }
  0x3a   :  { %1677 = shalt.err (!%p1674_p12)
}
  0x3b   :  { %s1678_s1 = scalar_lea.vmem %s1806_s30, 1024  ;;  %p1683_p0 = scmp.lt.s32.totalorder %s1806_s30, %s1806_s30 }
  0x3c   :  { %p1679_p13 = scmp.ne.s32.totalorder %s1806_s30, %s1678_s1  ;;  %p1684_p1 = scmp.lt.s32.totalorder %s1678_s1, %s1678_s1 }
  0x3e   :  { %p1685_p2 = por %p1684_p1, %p1683_p0 }
  0x40   :  { %p1686_p3 = pnand %p1685_p2, %p1679_p13 }
  0x42   :  { %1689 = shalt.err (!%p1686_p3)
}
  0x43   :  { %67 = dma.hbm_to_vmem [thread:$0]  %s1992_s5, 1024, %s1806_s30, [#allocation9], %s1722_s13, %s1722_s13, %s1723_s14  }
  0x44   :  { %1712 = dma.done.wait [#allocation3], 2048  }
  0x45   :  { %1713 = vsyncadd [#allocation3], 4294965248 }
  0x46   :  { %1714 = dma.done.wait [#allocation6], 2048  }
  0x47   :  { %1715 = vsyncadd [#allocation6], 4294965248 }
  0x48   :  { %1716 = dma.done.wait [#allocation9], 1024  }
  0x49   :  { %1717 = vsyncadd [#allocation9], 4294966272  ;;  %v1370_v0 = vld [vmem:[#allocation5] sm:$0xff]   ;;  %v1371_v1 = vld [vmem:[#allocation5 + $0x8] sm:$0xff]  }
  0x4a   :  { %1201 = vmatprep.subr.bf16.mxu0 %v1370_v0  ;;  %1345 = vmatprep.subr.bf16.mxu1 %v1370_v0  ;;  %v1372_v2 = vld [vmem:[#allocation5 + $0x10] sm:$0xff]   ;;  %v1373_v3 = vld [vmem:[#allocation5 + $0x18] sm:$0xff]   ;;  %v1378_v4 = vld [vmem:[#allocation2] sm:$0xff]  }
  0x4b   :  { %1202 = vmatpush3.bf16.msra.mxu0 %v1370_v0  ;;  %1353 = vmatpush3.bf16.msra.mxu1 %v1370_v0  ;;  %v1374_v5 = vld [vmem:[#allocation5 + $0x20] sm:$0xff]   ;;  %v1375_v6 = vld [vmem:[#allocation5 + $0x28] sm:$0xff]   ;;  %v1376_v8 = vld [vmem:[#allocation5 + $0x30] sm:$0xff]  }
  0x4c   :  { %1203 = vmatprep.subr.bf16.mxu0 %v1371_v1  ;;  %1346 = vmatprep.subr.bf16.mxu1 %v1371_v1  ;;  %v1386_v7 = vld [vmem:[#allocation2 + $0x40] sm:$0xff]   ;;  %v1377_v9 = vld [vmem:[#allocation5 + $0x38] sm:$0xff]   ;;  %v1379_v11 = vld [vmem:[#allocation2 + $0x8] sm:$0xff]  }
  0x4d   :  { %1217 = vmatprep.mubr.bf16.mxu0 %v1378_v4  ;;  %1233 = vmatprep.mubr.bf16.mxu1 %v1386_v7  ;;  %v1394_v10 = vld [vmem:[#allocation7] sm:$0xff]   ;;  %v1387_v12 = vld [vmem:[#allocation2 + $0x48] sm:$0xff]   ;;  %v1380_v13 = vld [vmem:[#allocation2 + $0x10] sm:$0xff]  }
  0x4e   :  { %v1388_v14 = vld [vmem:[#allocation2 + $0x50] sm:$0xff]   ;;  %v1395_v15 = vld [vmem:[#allocation7 + $0x8] sm:$0xff]   ;;  %v1381_v17 = vld [vmem:[#allocation2 + $0x18] sm:$0xff]  }
  0x4f   :  { %1204 = vmatpush3.bf16.msra.mxu0 %v1371_v1  ;;  %1354 = vmatpush3.bf16.msra.mxu1 %v1371_v1  ;;  %v1396_v16 = vld [vmem:[#allocation7 + $0x10] sm:$0xff]   ;;  %v1389_v18 = vld [vmem:[#allocation2 + $0x58] sm:$0xff]   ;;  %v1382_v19 = vld [vmem:[#allocation2 + $0x20] sm:$0xff]  }
  0x50   :  { %1205 = vmatprep.subr.bf16.mxu0 %v1372_v2  ;;  %1347 = vmatprep.subr.bf16.mxu1 %v1372_v2  ;;  %v1390_v20 = vld [vmem:[#allocation2 + $0x60] sm:$0xff]   ;;  %v1397_v21 = vld [vmem:[#allocation7 + $0x18] sm:$0xff]   ;;  %v1383_v22 = vld [vmem:[#allocation2 + $0x28] sm:$0xff]  }
  0x51   :  { %v1391_v23 = vld [vmem:[#allocation2 + $0x68] sm:$0xff]   ;;  %v1384_v24 = vld [vmem:[#allocation2 + $0x30] sm:$0xff]   ;;  %v1385_v26 = vld [vmem:[#allocation2 + $0x38] sm:$0xff]  }
  0x52   :  { %v1392_v25 = vld [vmem:[#allocation2 + $0x70] sm:$0xff]   ;;  %v1393_v27 = vld [vmem:[#allocation2 + $0x78] sm:$0xff]   ;;  %v1398_v28 = vld [vmem:[#allocation7 + $0x20] sm:$0xff]  }
  0x53   :  { %1206 = vmatpush3.bf16.msra.mxu0 %v1372_v2  ;;  %1355 = vmatpush3.bf16.msra.mxu1 %v1372_v2  ;;  %v1399_v29 = vld [vmem:[#allocation7 + $0x28] sm:$0xff]   ;;  %v1400_v30 = vld [vmem:[#allocation7 + $0x30] sm:$0xff]   ;;  %v1401_v31 = vld [vmem:[#allocation7 + $0x38] sm:$0xff]  }
  0x54   :  { %1207 = vmatprep.subr.bf16.mxu0 %v1373_v3  ;;  %1348 = vmatprep.subr.bf16.mxu1 %v1373_v3  ;;  %v1402_v32 = vld [vmem:[#allocation8] sm:$0xff]   ;;  %v1403_v33 = vld [vmem:[#allocation8 + $0x8] sm:$0xff]   ;;  %v1404_v34 = vld [vmem:[#allocation8 + $0x10] sm:$0xff]  }
  0x55   :  { %v1405_v35 = vld [vmem:[#allocation8 + $0x18] sm:$0xff]   ;;  %v1846_v36 = vld [vmem:[%s1989_s2] ss:$0 sm:$0xff] }
  0x57   :  { %1208 = vmatpush3.bf16.msra.mxu0 %v1373_v3  ;;  %1356 = vmatpush3.bf16.msra.mxu1 %v1373_v3 }
  0x58   :  { %1209 = vmatprep.subr.bf16.mxu0 %v1374_v5  ;;  %1349 = vmatprep.subr.bf16.mxu1 %v1374_v5 }
  0x5b   :  { %1210 = vmatpush3.bf16.msra.mxu0 %v1374_v5  ;;  %1357 = vmatpush3.bf16.msra.mxu1 %v1374_v5 }
  0x5c   :  { %1211 = vmatprep.subr.bf16.mxu0 %v1375_v6  ;;  %1350 = vmatprep.subr.bf16.mxu1 %v1375_v6 }
  0x5f   :  { %1212 = vmatpush3.bf16.msra.mxu0 %v1375_v6  ;;  %1358 = vmatpush3.bf16.msra.mxu1 %v1375_v6 }
  0x60   :  { %1213 = vmatprep.subr.bf16.mxu0 %v1376_v8  ;;  %1351 = vmatprep.subr.bf16.mxu1 %v1376_v8 }
  0x63   :  { %1214 = vmatpush3.bf16.msra.mxu0 %v1376_v8  ;;  %1359 = vmatpush3.bf16.msra.mxu1 %v1376_v8 }
  0x64   :  { %1215 = vmatprep.subr.bf16.mxu0 %v1377_v9  ;;  %1352 = vmatprep.subr.bf16.mxu1 %v1377_v9 }
  0x67   :  { %1216 = vmatpush3.bf16.msra.mxu0 %v1377_v9  ;;  %1360 = vmatpush3.bf16.msra.mxu1 %v1377_v9 }
  0x68   :  { %1249 = vmatprep.subr.bf16.mxu1 %v1394_v10  ;;  %1297 = vmatprep.subr.bf16.mxu0 %v1402_v32 }
  0x6a   :  { %1218 = vmatmul.mubr.bf16.vlgmr.msra.gmra.mrb[0].mxu0 %v1379_v11  ;;  %1234 = vmatmul.mubr.bf16.vlgmr.msra.gmra.mrb[0].mxu1 %v1387_v12 }
  0x6b   :  { %1221 = vmatprep.mubr.bf16.mxu0 %v1380_v13  ;;  %1237 = vmatprep.mubr.bf16.mxu1 %v1388_v14 }
  0x6c   :  { %1250 = vmatpush3.bf16.msra.mxu1 %v1394_v10  ;;  %1298 = vmatpush3.bf16.msra.mxu0 %v1402_v32 }
  0x6d   :  { %1251 = vmatprep.subr.bf16.mxu1 %v1395_v15  ;;  %1299 = vmatprep.subr.bf16.mxu0 %v1403_v33 }
  0x70   :  { %1252 = vmatpush3.bf16.msra.mxu1 %v1395_v15  ;;  %1300 = vmatpush3.bf16.msra.mxu0 %v1403_v33 }
  0x71   :  { %1253 = vmatprep.subr.bf16.mxu1 %v1396_v16  ;;  %1301 = vmatprep.subr.bf16.mxu0 %v1404_v34 }
  0x72   :  { %1222 = vmatmul.mubr.bf16.gmra.mrb[4].mxu0 %v1381_v17  ;;  %1238 = vmatmul.mubr.bf16.gmra.mrb[4].mxu1 %v1389_v18 }
  0x73   :  { %1225 = vmatprep.mubr.bf16.mxu0 %v1382_v19  ;;  %1241 = vmatprep.mubr.bf16.mxu1 %v1390_v20 }
  0x74   :  { %1254 = vmatpush3.bf16.msra.mxu1 %v1396_v16  ;;  %1302 = vmatpush3.bf16.msra.mxu0 %v1404_v34 }
  0x75   :  { %1255 = vmatprep.subr.bf16.mxu1 %v1397_v21  ;;  %1303 = vmatprep.subr.bf16.mxu0 %v1405_v35 }
  0x78   :  { %1256 = vmatpush3.bf16.msra.mxu1 %v1397_v21  ;;  %1304 = vmatpush3.bf16.msra.mxu0 %v1405_v35 }
  0x79   :  { %1257 = vmatprep.subr.bf16.mxu1 %v1398_v28 }
  0x7a   :  { %1226 = vmatmul.mubr.bf16.gmra.mrb[8].mxu0 %v1383_v22  ;;  %1242 = vmatmul.mubr.bf16.gmra.mrb[8].mxu1 %v1391_v23 }
  0x7b   :  { %1229 = vmatprep.mubr.bf16.mxu0 %v1384_v24  ;;  %1245 = vmatprep.mubr.bf16.mxu1 %v1392_v25 }
  0x7c   :  { %1258 = vmatpush3.bf16.msra.mxu1 %v1398_v28 }
  0x7d   :  { %1259 = vmatprep.subr.bf16.mxu1 %v1399_v29 }
  0x80   :  { %1260 = vmatpush3.bf16.msra.mxu1 %v1399_v29 }
  0x81   :  { %1261 = vmatprep.subr.bf16.mxu1 %v1400_v30 }
  0x82   :  { %1230 = vmatmul.mubr.bf16.gmra.mrb[12].mxu0 %v1385_v26  ;;  %1246 = vmatmul.mubr.bf16.gmra.mrb[12].mxu1 %v1393_v27 }
  0x84   :  { %1262 = vmatpush3.bf16.msra.mxu1 %v1400_v30 }
  0x85   :  { %1263 = vmatprep.subr.bf16.mxu1 %v1401_v31 }
  0x88   :  { %1264 = vmatpush3.bf16.msra.mxu1 %v1401_v31 }
 0x13d   :  { %v1219_v37 = vpop.f32.mrb[0].mxu0  ;;  %v1235_v38 = vpop.f32.mrb[0].mxu1 }
 0x13e   :  { %v325_v39 = vadd.f32 %v1219_v37, %v1846_v36  ;;  %v316_v40 = vpop.f32.mrb[1].mxu0  ;;  %v380_v41 = vpop.f32.mrb[1].mxu1  ;;  %v389_v47 = vadd.f32 %v1235_v38, %v1846_v36 }
 0x13f   :  { %v317_v42 = vadd.f32 %v1846_v36, %v316_v40  ;;  %v1220_v43 = vpop.f32.mrb[2].mxu0  ;;  %v1236_v44 = vpop.f32.mrb[2].mxu1  ;;  %v381_v50 = vadd.f32 %v1846_v36, %v380_v41 }
 0x140   :  { %1410 = vtanh.f32 %v325_v39  ;;  %v328_v45 = vadd.f32 %v1220_v43, %v1846_v36  ;;  %v319_v46 = vpop.f32.mrb[3].mxu0  ;;  %v383_v48 = vpop.f32.mrb[3].mxu1  ;;  %v392_v51 = vadd.f32 %v1236_v44, %v1846_v36 }
 0x141   :  { %1412 = vtanh.f32 %v317_v42  ;;  %v320_v49 = vadd.f32 %v1846_v36, %v319_v46  ;;  %v384_v52 = vadd.f32 %v1846_v36, %v383_v48 }
 0x142   :  { %1414 = vtanh.f32 %v328_v45 }
 0x143   :  { %1416 = vtanh.f32 %v320_v49 }
 0x144   :  { %1418 = vtanh.f32 %v389_v47 }
 0x145   :  { %v1223_v53 = vpop.f32.mrb[4].mxu0  ;;  %1420 = vtanh.f32 %v381_v50  ;;  %v1239_v54 = vpop.f32.mrb[4].mxu1 }
 0x146   :  { %v341_v55 = vadd.f32 %v1223_v53, %v1846_v36  ;;  %v332_v56 = vpop.f32.mrb[5].mxu0  ;;  %1422 = vtanh.f32 %v392_v51  ;;  %v396_v57 = vpop.f32.mrb[5].mxu1  ;;  %v405_v63 = vadd.f32 %v1239_v54, %v1846_v36 }
 0x147   :  { %v333_v58 = vadd.f32 %v1846_v36, %v332_v56  ;;  %v1224_v59 = vpop.f32.mrb[6].mxu0  ;;  %1424 = vtanh.f32 %v384_v52  ;;  %v1240_v60 = vpop.f32.mrb[6].mxu1  ;;  %v397_v2 = vadd.f32 %v1846_v36, %v396_v57 }
 0x148   :  { %1426 = vtanh.f32 %v341_v55  ;;  %v344_v61 = vadd.f32 %v1224_v59, %v1846_v36  ;;  %v335_v62 = vpop.f32.mrb[7].mxu0  ;;  %v399_v0 = vpop.f32.mrb[7].mxu1  ;;  %v408_v4 = vadd.f32 %v1240_v60, %v1846_v36 }
 0x149   :  { %1428 = vtanh.f32 %v333_v58  ;;  %v336_v1 = vadd.f32 %v1846_v36, %v335_v62  ;;  %v400_v6 = vadd.f32 %v1846_v36, %v399_v0 }
 0x14a   :  { %v1411_v3 = vpop.eup %1410  ;;  %1430 = vtanh.f32 %v344_v61 }
 0x14b   :  { %v1413_v5 = vpop.eup %1412  ;;  %1432 = vtanh.f32 %v336_v1 }
 0x14c   :  { %v1415_v7 = vpop.eup %1414  ;;  %1434 = vtanh.f32 %v405_v63 }
 0x14d   :  { %v1417_v8 = vpop.eup %1416  ;;  %v1227_v9 = vpop.f32.mrb[8].mxu0  ;;  %v476_v10 = vpack.c.bf16 %v1415_v7, %v1411_v3  ;;  %1436 = vtanh.f32 %v397_v2 }
 0x14e   :  { %v1243_v11 = vpop.f32.mrb[8].mxu1  ;;  %v1864_v12 = vpop.eup %1418  ;;  %v357_v13 = vadd.f32 %v1227_v9, %v1846_v36  ;;  %v475_v15 = vpack.c.bf16 %v1417_v8, %v1413_v5  ;;  %1438 = vtanh.f32 %v408_v4 }
 0x14f   :  { %v348_v14 = vpop.f32.mrb[9].mxu0  ;;  %v412_v16 = vpop.f32.mrb[9].mxu1  ;;  %1440 = vtanh.f32 %v400_v6  ;;  %v421_v24 = vadd.f32 %v1243_v11, %v1846_v36 }
 0x150   :  { %v1867_v17 = vpop.eup %1420  ;;  %v349_v18 = vadd.f32 %v1846_v36, %v348_v14  ;;  %v1228_v19 = vpop.f32.mrb[10].mxu0  ;;  %1442 = vtanh.f32 %v357_v13  ;;  %1265 = vmatprep.mubr.bf16.mxu1 %v475_v15  ;;  %v413_v28 = vadd.f32 %v1846_v36, %v412_v16 }
 0x151   :  { %v1244_v20 = vpop.f32.mrb[10].mxu1  ;;  %v1870_v21 = vpop.eup %1422  ;;  %v360_v22 = vadd.f32 %v1228_v19, %v1846_v36  ;;  %1266 = vmatmul.mubr.bf16.vlgmr.msra.gmra.mrb[16].mxu1 %v476_v10 }
 0x152   :  { %v351_v23 = vpop.f32.mrb[11].mxu0  ;;  %v415_v25 = vpop.f32.mrb[11].mxu1  ;;  %1444 = vtanh.f32 %v349_v18  ;;  %v484_v29 = vpack.c.bf16 %v1870_v21, %v1864_v12  ;;  %v424_v31 = vadd.f32 %v1244_v20, %v1846_v36  ;;  %v1904_v12 = vld [vmem:[%s1991_s4] ss:$0 sm:$0xff] }
 0x153   :  { %v1874_v26 = vpop.eup %1424  ;;  %v352_v27 = vadd.f32 %v1846_v36, %v351_v23  ;;  %1446 = vtanh.f32 %v360_v22  ;;  %v416_v34 = vadd.f32 %v1846_v36, %v415_v25  ;;  %v1407_v25 = vld [vmem:[#allocation8 + $0x28] sm:$0xff]  }
 0x154   :  { %v1427_v30 = vpop.eup %1426  ;;  %v483_v32 = vpack.c.bf16 %v1874_v26, %v1867_v17  ;;  %v1409_v17 = vld [vmem:[#allocation8 + $0x38] sm:$0xff]  }
 0x155   :  { %v1429_v33 = vpop.eup %1428  ;;  %1448 = vtanh.f32 %v352_v27  ;;  %v1231_v38 = vpop.f32.mrb[12].mxu0  ;;  %v1408_v27 = vld [vmem:[#allocation8 + $0x30] sm:$0xff]  }
 0x156   :  { %v1431_v35 = vpop.eup %1430  ;;  %1450 = vtanh.f32 %v421_v24  ;;  %v1247_v40 = vpop.f32.mrb[12].mxu1  ;;  %v373_v42 = vadd.f32 %v1231_v38, %v1846_v36  ;;  %v1406_v24 = vld [vmem:[#allocation8 + $0x20] sm:$0xff]  }
 0x157   :  { %v1433_v37 = vpop.eup %1432  ;;  %v478_v39 = vpack.c.bf16 %v1431_v35, %v1427_v30  ;;  %1452 = vtanh.f32 %v413_v28  ;;  %v364_v43 = vpop.f32.mrb[13].mxu0  ;;  %v437_v53 = vadd.f32 %v1247_v40, %v1846_v36  ;;  %1305 = vmatprep.subr.bf16.mxu0 %v1406_v24 }
 0x158   :  { %v1884_v41 = vpop.eup %1434  ;;  %v477_v44 = vpack.c.bf16 %v1433_v37, %v1429_v33  ;;  %1454 = vtanh.f32 %v424_v31  ;;  %v428_v45 = vpop.f32.mrb[13].mxu1  ;;  %v365_v47 = vadd.f32 %v1846_v36, %v364_v43  ;;  %1306 = vmatpush3.bf16.msra.mxu0 %v1406_v24 }
 0x159   :  { %v1437_v46 = vpop.eup %1436  ;;  %v1232_v48 = vpop.f32.mrb[14].mxu0  ;;  %1456 = vtanh.f32 %v416_v34  ;;  %v429_v57 = vadd.f32 %v1846_v36, %v428_v45  ;;  %1307 = vmatprep.subr.bf16.mxu0 %v1407_v25 }
 0x15a   :  { %v1248_v49 = vpop.f32.mrb[14].mxu1  ;;  %v1439_v50 = vpop.eup %1438  ;;  %1458 = vtanh.f32 %v373_v42  ;;  %v376_v51 = vadd.f32 %v1232_v48, %v1846_v36  ;;  %1269 = vmatprep.mubr.bf16.mxu1 %v477_v44 }
 0x15b   :  { %v367_v52 = vpop.f32.mrb[15].mxu0  ;;  %v431_v54 = vpop.f32.mrb[15].mxu1  ;;  %1460 = vtanh.f32 %v365_v47  ;;  %1270 = vmatmul.mubr.bf16.gmra.mrb[20].mxu1 %v478_v39  ;;  %v486_v58 = vpack.c.bf16 %v1439_v50, %v1884_v41  ;;  %v440_v60 = vadd.f32 %v1248_v49, %v1846_v36 }
 0x15c   :  { %v1441_v55 = vpop.eup %1440  ;;  %v368_v56 = vadd.f32 %v1846_v36, %v367_v52  ;;  %1462 = vtanh.f32 %v376_v51  ;;  %v432_v63 = vadd.f32 %v1846_v36, %v431_v54  ;;  %1308 = vmatpush3.bf16.msra.mxu0 %v1407_v25 }
 0x15d   :  { %v1443_v59 = vpop.eup %1442  ;;  %v485_v61 = vpack.c.bf16 %v1441_v55, %v1437_v46  ;;  %1309 = vmatprep.subr.bf16.mxu0 %v1408_v27 }
 0x15e   :  { %v1445_v62 = vpop.eup %1444  ;;  %1464 = vtanh.f32 %v368_v56 }
 0x15f   :  { %v1447_v0 = vpop.eup %1446  ;;  %1466 = vtanh.f32 %v437_v53 }
 0x160   :  { %v1449_v1 = vpop.eup %1448  ;;  %v480_v2 = vpack.c.bf16 %v1447_v0, %v1443_v59  ;;  %1468 = vtanh.f32 %v429_v57  ;;  %1310 = vmatpush3.bf16.msra.mxu0 %v1408_v27 }
 0x161   :  { %v1451_v3 = vpop.eup %1450  ;;  %v479_v4 = vpack.c.bf16 %v1449_v1, %v1445_v62  ;;  %1470 = vtanh.f32 %v440_v60  ;;  %1311 = vmatprep.subr.bf16.mxu0 %v1409_v17 }
 0x162   :  { %v1453_v5 = vpop.eup %1452  ;;  %1472 = vtanh.f32 %v432_v63 }
 0x163   :  { %v1455_v6 = vpop.eup %1454  ;;  %1273 = vmatprep.mubr.bf16.mxu1 %v479_v4 }
 0x164   :  { %v1457_v7 = vpop.eup %1456  ;;  %1274 = vmatmul.mubr.bf16.gmra.mrb[24].mxu1 %v480_v2  ;;  %v488_v8 = vpack.c.bf16 %v1455_v6, %v1451_v3  ;;  %1312 = vmatpush3.bf16.msra.mxu0 %v1409_v17 }
 0x165   :  { %v1459_v9 = vpop.eup %1458  ;;  %v487_v10 = vpack.c.bf16 %v1457_v7, %v1453_v5 }
 0x166   :  { %v1461_v11 = vpop.eup %1460 }
 0x167   :  { %v1463_v13 = vpop.eup %1462 }
 0x168   :  { %v1465_v36 = vpop.eup %1464  ;;  %v482_v14 = vpack.c.bf16 %v1463_v13, %v1459_v9 }
 0x169   :  { %v1467_v15 = vpop.eup %1466  ;;  %v481_v16 = vpack.c.bf16 %v1465_v36, %v1461_v11 }
 0x16a   :  { %v1469_v18 = vpop.eup %1468 }
 0x16b   :  { %v1471_v19 = vpop.eup %1470  ;;  %1277 = vmatprep.mubr.bf16.mxu1 %v481_v16 }
 0x16c   :  { %v1473_v20 = vpop.eup %1472  ;;  %1278 = vmatmul.mubr.bf16.gmra.mrb[28].mxu1 %v482_v14  ;;  %v490_v22 = vpack.c.bf16 %v1471_v19, %v1467_v15 }
 0x16d   :  { %1281 = vmatprep.mubr.bf16.mxu1 %v483_v32  ;;  %v489_v23 = vpack.c.bf16 %v1473_v20, %v1469_v18 }
 0x174   :  { %1282 = vmatmul.mubr.bf16.gmra.mrb[32].mxu1 %v484_v29 }
 0x175   :  { %1285 = vmatprep.mubr.bf16.mxu1 %v485_v61 }
 0x17c   :  { %1286 = vmatmul.mubr.bf16.gmra.mrb[36].mxu1 %v486_v58 }
 0x17d   :  { %1289 = vmatprep.mubr.bf16.mxu1 %v487_v10 }
 0x184   :  { %1290 = vmatmul.mubr.bf16.gmra.mrb[40].mxu1 %v488_v8 }
 0x185   :  { %1293 = vmatprep.mubr.bf16.mxu1 %v489_v23 }
 0x18c   :  { %1294 = vmatmul.mubr.bf16.gmra.mrb[44].mxu1 %v490_v22 }
 0x224   :  { %v1267_v21 = vpop.f32.mrb[16].mxu1 }
 0x225   :  { %v605_v26 = vadd.f32 %v1267_v21, %v1904_v12  ;;  %v596_v28 = vpop.f32.mrb[17].mxu1 }
 0x226   :  { %v597_v29 = vadd.f32 %v1904_v12, %v596_v28  ;;  %v1268_v30 = vpop.f32.mrb[18].mxu1 }
 0x227   :  { %1474 = vtanh.f32 %v605_v26  ;;  %v608_v31 = vadd.f32 %v1268_v30, %v1904_v12  ;;  %v599_v32 = vpop.f32.mrb[19].mxu1 }
 0x228   :  { %1476 = vtanh.f32 %v597_v29  ;;  %v600_v33 = vadd.f32 %v1904_v12, %v599_v32 }
 0x229   :  { %1478 = vtanh.f32 %v608_v31 }
 0x22a   :  { %1480 = vtanh.f32 %v600_v33 }
 0x22e   :  { %v1271_v34 = vpop.f32.mrb[20].mxu1 }
 0x22f   :  { %v621_v35 = vadd.f32 %v1271_v34, %v1904_v12  ;;  %v612_v37 = vpop.f32.mrb[21].mxu1 }
 0x230   :  { %v613_v38 = vadd.f32 %v1904_v12, %v612_v37  ;;  %v1272_v39 = vpop.f32.mrb[22].mxu1 }
 0x231   :  { %1482 = vtanh.f32 %v621_v35  ;;  %v624_v40 = vadd.f32 %v1272_v39, %v1904_v12  ;;  %v615_v41 = vpop.f32.mrb[23].mxu1  ;;  %v1475_v43 = vpop.eup %1474 }
 0x232   :  { %1484 = vtanh.f32 %v613_v38  ;;  %v616_v42 = vadd.f32 %v1904_v12, %v615_v41  ;;  %v1477_v44 = vpop.eup %1476 }
 0x233   :  { %1486 = vtanh.f32 %v624_v40  ;;  %v1479_v45 = vpop.eup %1478 }
 0x234   :  { %1488 = vtanh.f32 %v616_v42  ;;  %v1481_v46 = vpop.eup %1480  ;;  %v756_v48 = vpack.c.bf16 %v1479_v45, %v1475_v43 }
 0x235   :  { %v755_v51 = vpack.c.bf16 %v1481_v46, %v1477_v44 }
 0x237   :  { %v1275_v47 = vpop.f32.mrb[24].mxu1  ;;  %1313 = vmatprep.mubr.bf16.mxu0 %v755_v51 }
 0x238   :  { %v637_v49 = vadd.f32 %v1275_v47, %v1904_v12  ;;  %v628_v50 = vpop.f32.mrb[25].mxu1  ;;  %1314 = vmatmul.mubr.bf16.vlgmr.msra.gmra.mrb[16].mxu0 %v756_v48 }
 0x239   :  { %v629_v52 = vadd.f32 %v1904_v12, %v628_v50  ;;  %v1276_v53 = vpop.f32.mrb[26].mxu1 }
 0x23a   :  { %1490 = vtanh.f32 %v637_v49  ;;  %v640_v54 = vadd.f32 %v1276_v53, %v1904_v12  ;;  %v631_v55 = vpop.f32.mrb[27].mxu1 }
 0x23b   :  { %1492 = vtanh.f32 %v629_v52  ;;  %v632_v56 = vadd.f32 %v1904_v12, %v631_v55  ;;  %v1483_v57 = vpop.eup %1482 }
 0x23c   :  { %1494 = vtanh.f32 %v640_v54  ;;  %v1485_v58 = vpop.eup %1484 }
 0x23d   :  { %1496 = vtanh.f32 %v632_v56  ;;  %v1487_v59 = vpop.eup %1486 }
 0x23e   :  { %v1489_v60 = vpop.eup %1488  ;;  %v758_v62 = vpack.c.bf16 %v1487_v59, %v1483_v57 }
 0x23f   :  { %v1279_v61 = vpop.f32.mrb[28].mxu1  ;;  %v757_v1 = vpack.c.bf16 %v1489_v60, %v1485_v58 }
 0x240   :  { %v653_v63 = vadd.f32 %v1279_v61, %v1904_v12  ;;  %v644_v0 = vpop.f32.mrb[29].mxu1 }
 0x241   :  { %v645_v2 = vadd.f32 %v1904_v12, %v644_v0  ;;  %v1280_v3 = vpop.f32.mrb[30].mxu1  ;;  %1317 = vmatprep.mubr.bf16.mxu0 %v757_v1 }
 0x242   :  { %1498 = vtanh.f32 %v653_v63  ;;  %v656_v4 = vadd.f32 %v1280_v3, %v1904_v12  ;;  %v647_v5 = vpop.f32.mrb[31].mxu1  ;;  %1318 = vmatmul.mubr.bf16.gmra.mrb[20].mxu0 %v758_v62 }
 0x243   :  { %1500 = vtanh.f32 %v645_v2  ;;  %v648_v6 = vadd.f32 %v1904_v12, %v647_v5 }
 0x244   :  { %v1491_v7 = vpop.eup %1490  ;;  %1502 = vtanh.f32 %v656_v4 }
 0x245   :  { %v1493_v8 = vpop.eup %1492  ;;  %1504 = vtanh.f32 %v648_v6 }
 0x246   :  { %v1495_v9 = vpop.eup %1494 }
 0x247   :  { %v1497_v10 = vpop.eup %1496  ;;  %v1283_v11 = vpop.f32.mrb[32].mxu1  ;;  %v760_v13 = vpack.c.bf16 %v1495_v9, %v1491_v7 }
 0x248   :  { %v669_v36 = vadd.f32 %v1283_v11, %v1904_v12  ;;  %v660_v14 = vpop.f32.mrb[33].mxu1  ;;  %v759_v15 = vpack.c.bf16 %v1497_v10, %v1493_v8 }
 0x249   :  { %v661_v16 = vadd.f32 %v1904_v12, %v660_v14  ;;  %v1284_v18 = vpop.f32.mrb[34].mxu1 }
 0x24a   :  { %1506 = vtanh.f32 %v669_v36  ;;  %v672_v19 = vadd.f32 %v1284_v18, %v1904_v12  ;;  %v663_v20 = vpop.f32.mrb[35].mxu1  ;;  %1321 = vmatprep.mubr.bf16.mxu0 %v759_v15 }
 0x24b   :  { %1508 = vtanh.f32 %v661_v16  ;;  %v664_v22 = vadd.f32 %v1904_v12, %v663_v20  ;;  %1322 = vmatmul.mubr.bf16.gmra.mrb[24].mxu0 %v760_v13 }
 0x24c   :  { %v1499_v23 = vpop.eup %1498  ;;  %1510 = vtanh.f32 %v672_v19 }
 0x24d   :  { %v1501_v24 = vpop.eup %1500  ;;  %1512 = vtanh.f32 %v664_v22 }
 0x24e   :  { %v1503_v25 = vpop.eup %1502 }
 0x24f   :  { %v1505_v27 = vpop.eup %1504  ;;  %v1287_v17 = vpop.f32.mrb[36].mxu1  ;;  %v762_v21 = vpack.c.bf16 %v1503_v25, %v1499_v23 }
 0x250   :  { %v685_v26 = vadd.f32 %v1287_v17, %v1904_v12  ;;  %v676_v28 = vpop.f32.mrb[37].mxu1  ;;  %v761_v29 = vpack.c.bf16 %v1505_v27, %v1501_v24 }
 0x251   :  { %v677_v30 = vadd.f32 %v1904_v12, %v676_v28  ;;  %v1288_v31 = vpop.f32.mrb[38].mxu1 }
 0x252   :  { %1514 = vtanh.f32 %v685_v26  ;;  %v688_v32 = vadd.f32 %v1288_v31, %v1904_v12  ;;  %v679_v33 = vpop.f32.mrb[39].mxu1  ;;  %1325 = vmatprep.mubr.bf16.mxu0 %v761_v29 }
 0x253   :  { %1516 = vtanh.f32 %v677_v30  ;;  %v680_v34 = vadd.f32 %v1904_v12, %v679_v33  ;;  %1326 = vmatmul.mubr.bf16.gmra.mrb[28].mxu0 %v762_v21 }
 0x254   :  { %v1507_v35 = vpop.eup %1506  ;;  %1518 = vtanh.f32 %v688_v32 }
 0x255   :  { %v1509_v37 = vpop.eup %1508  ;;  %1520 = vtanh.f32 %v680_v34 }
 0x256   :  { %v1511_v38 = vpop.eup %1510 }
 0x257   :  { %v1513_v39 = vpop.eup %1512  ;;  %v1291_v40 = vpop.f32.mrb[40].mxu1  ;;  %v764_v41 = vpack.c.bf16 %v1511_v38, %v1507_v35 }
 0x258   :  { %v701_v42 = vadd.f32 %v1291_v40, %v1904_v12  ;;  %v692_v43 = vpop.f32.mrb[41].mxu1  ;;  %v763_v44 = vpack.c.bf16 %v1513_v39, %v1509_v37 }
 0x259   :  { %v693_v45 = vadd.f32 %v1904_v12, %v692_v43  ;;  %v1292_v46 = vpop.f32.mrb[42].mxu1 }
 0x25a   :  { %1522 = vtanh.f32 %v701_v42  ;;  %v704_v47 = vadd.f32 %v1292_v46, %v1904_v12  ;;  %v695_v48 = vpop.f32.mrb[43].mxu1  ;;  %1329 = vmatprep.mubr.bf16.mxu0 %v763_v44 }
 0x25b   :  { %1524 = vtanh.f32 %v693_v45  ;;  %v696_v49 = vadd.f32 %v1904_v12, %v695_v48  ;;  %1330 = vmatmul.mubr.bf16.gmra.mrb[32].mxu0 %v764_v41 }
 0x25c   :  { %v1515_v50 = vpop.eup %1514  ;;  %1526 = vtanh.f32 %v704_v47 }
 0x25d   :  { %v1517_v51 = vpop.eup %1516  ;;  %1528 = vtanh.f32 %v696_v49 }
 0x25e   :  { %v1519_v52 = vpop.eup %1518 }
 0x25f   :  { %v1521_v53 = vpop.eup %1520  ;;  %v1295_v54 = vpop.f32.mrb[44].mxu1  ;;  %v766_v55 = vpack.c.bf16 %v1519_v52, %v1515_v50 }
 0x260   :  { %v717_v56 = vadd.f32 %v1295_v54, %v1904_v12  ;;  %v708_v57 = vpop.f32.mrb[45].mxu1  ;;  %v765_v58 = vpack.c.bf16 %v1521_v53, %v1517_v51 }
 0x261   :  { %v709_v59 = vadd.f32 %v1904_v12, %v708_v57  ;;  %v1296_v60 = vpop.f32.mrb[46].mxu1 }
 0x262   :  { %1530 = vtanh.f32 %v717_v56  ;;  %v720_v61 = vadd.f32 %v1296_v60, %v1904_v12  ;;  %v711_v62 = vpop.f32.mrb[47].mxu1  ;;  %1333 = vmatprep.mubr.bf16.mxu0 %v765_v58 }
 0x263   :  { %1532 = vtanh.f32 %v709_v59  ;;  %v712_v63 = vadd.f32 %v1904_v12, %v711_v62  ;;  %1334 = vmatmul.mubr.bf16.gmra.mrb[36].mxu0 %v766_v55  ;;  %v1941_v12 = vld [vmem:[%s1993_s6] ss:$0 sm:$0xff]  ;;  %s1726_s6 = smov [#allocation10]  }
 0x264   :  { %v1523_v0 = vpop.eup %1522  ;;  %1534 = vtanh.f32 %v720_v61  ;;  %s1072_s28 = sshll.u32 %s1726_s6, 4  ;;  %s1073_s28 = int_to_ptr.vmem [resolvable:$true] %s1072_s28 }
 0x265   :  { %v1525_v1 = vpop.eup %1524  ;;  %1536 = vtanh.f32 %v712_v63  ;;  %s1690_s29 = scalar_lea.vmem %s1073_s28, 4096  ;;  %p1695_p5 = scmp.lt.s32.totalorder %s1073_s28, %s1073_s28 }
 0x266   :  { %v1527_v2 = vpop.eup %1526  ;;  %p1691_p4 = scmp.ne.s32.totalorder %s1073_s28, %s1690_s29  ;;  %p1696_p6 = scmp.lt.s32.totalorder %s1690_s29, %s1690_s29 }
 0x267   :  { %v1529_v3 = vpop.eup %1528  ;;  %v768_v4 = vpack.c.bf16 %v1527_v2, %v1523_v0 }
 0x268   :  { %v767_v5 = vpack.c.bf16 %v1529_v3, %v1525_v1  ;;  %p1697_p7 = por %p1696_p6, %p1695_p5 }
 0x26a   :  { %1337 = vmatprep.mubr.bf16.mxu0 %v767_v5  ;;  %p1698_p8 = pnand %p1697_p7, %p1691_p4 }
 0x26b   :  { %1338 = vmatmul.mubr.bf16.gmra.mrb[40].mxu0 %v768_v4 }
 0x26c   :  { %v1531_v6 = vpop.eup %1530 }
 0x26d   :  { %v1533_v7 = vpop.eup %1532 }
 0x26e   :  { %v1535_v8 = vpop.eup %1534 }
 0x26f   :  { %v1537_v9 = vpop.eup %1536  ;;  %v770_v10 = vpack.c.bf16 %v1535_v8, %v1531_v6 }
 0x270   :  { %v769_v11 = vpack.c.bf16 %v1537_v9, %v1533_v7 }
 0x272   :  { %1341 = vmatprep.mubr.bf16.mxu0 %v769_v11 }
 0x273   :  { %1342 = vmatmul.mubr.bf16.gmra.mrb[44].mxu0 %v770_v10 }
 0x30b   :  { %v1315_v13 = vpop.f32.mrb[16].mxu0 }
 0x30c   :  { %v885_v36 = vadd.f32 %v1315_v13, %v1941_v12  ;;  %v876_v14 = vpop.f32.mrb[17].mxu0 }
 0x30d   :  { %v877_v15 = vadd.f32 %v1941_v12, %v876_v14  ;;  %v1316_v16 = vpop.f32.mrb[18].mxu0 }
 0x30e   :  { %1538 = vtanh.f32 %v885_v36  ;;  %v888_v18 = vadd.f32 %v1316_v16, %v1941_v12  ;;  %v879_v19 = vpop.f32.mrb[19].mxu0 }
 0x30f   :  { %1540 = vtanh.f32 %v877_v15  ;;  %v880_v20 = vadd.f32 %v1941_v12, %v879_v19 }
 0x310   :  { %1542 = vtanh.f32 %v888_v18 }
 0x311   :  { %1544 = vtanh.f32 %v880_v20 }
 0x315   :  { %v1319_v22 = vpop.f32.mrb[20].mxu0 }
 0x316   :  { %v901_v23 = vadd.f32 %v1319_v22, %v1941_v12  ;;  %v892_v24 = vpop.f32.mrb[21].mxu0 }
 0x317   :  { %v893_v25 = vadd.f32 %v1941_v12, %v892_v24  ;;  %v1320_v27 = vpop.f32.mrb[22].mxu0 }
 0x318   :  { %1546 = vtanh.f32 %v901_v23  ;;  %v904_v17 = vadd.f32 %v1320_v27, %v1941_v12  ;;  %v895_v21 = vpop.f32.mrb[23].mxu0  ;;  %v1539_v28 = vpop.eup %1538 }
 0x319   :  { %1548 = vtanh.f32 %v893_v25  ;;  %v896_v26 = vadd.f32 %v1941_v12, %v895_v21  ;;  %v1541_v29 = vpop.eup %1540  ;;  %1037 = vst [vmem:[#allocation10 + $0x10] sm:$0xff] %v1539_v28 }
 0x31a   :  { %1550 = vtanh.f32 %v904_v17  ;;  %v1543_v30 = vpop.eup %1542  ;;  %1035 = vst [vmem:[#allocation10] sm:$0xff] %v1541_v29 }
 0x31b   :  { %1552 = vtanh.f32 %v896_v26  ;;  %v1545_v31 = vpop.eup %1544  ;;  %1038 = vst [vmem:[#allocation10 + $0x18] sm:$0xff] %v1543_v30 }
 0x31c   :  { %1036 = vst [vmem:[#allocation10 + $0x8] sm:$0xff] %v1545_v31 }
 0x31e   :  { %v1323_v32 = vpop.f32.mrb[24].mxu0 }
 0x31f   :  { %v917_v33 = vadd.f32 %v1323_v32, %v1941_v12  ;;  %v908_v34 = vpop.f32.mrb[25].mxu0 }
 0x320   :  { %v909_v35 = vadd.f32 %v1941_v12, %v908_v34  ;;  %v1324_v37 = vpop.f32.mrb[26].mxu0 }
 0x321   :  { %1554 = vtanh.f32 %v917_v33  ;;  %v920_v38 = vadd.f32 %v1324_v37, %v1941_v12  ;;  %v911_v39 = vpop.f32.mrb[27].mxu0 }
 0x322   :  { %1556 = vtanh.f32 %v909_v35  ;;  %v912_v40 = vadd.f32 %v1941_v12, %v911_v39  ;;  %v1547_v41 = vpop.eup %1546 }
 0x323   :  { %1558 = vtanh.f32 %v920_v38  ;;  %v1549_v42 = vpop.eup %1548  ;;  %1041 = vst [vmem:[#allocation10 + $0x30] sm:$0xff] %v1547_v41 }
 0x324   :  { %1560 = vtanh.f32 %v912_v40  ;;  %v1551_v43 = vpop.eup %1550  ;;  %1039 = vst [vmem:[#allocation10 + $0x20] sm:$0xff] %v1549_v42 }
 0x325   :  { %v1553_v44 = vpop.eup %1552  ;;  %1042 = vst [vmem:[#allocation10 + $0x38] sm:$0xff] %v1551_v43 }
 0x326   :  { %v1327_v45 = vpop.f32.mrb[28].mxu0  ;;  %1040 = vst [vmem:[#allocation10 + $0x28] sm:$0xff] %v1553_v44 }
 0x327   :  { %v933_v46 = vadd.f32 %v1327_v45, %v1941_v12  ;;  %v924_v47 = vpop.f32.mrb[29].mxu0 }
 0x328   :  { %v925_v48 = vadd.f32 %v1941_v12, %v924_v47  ;;  %v1328_v49 = vpop.f32.mrb[30].mxu0 }
 0x329   :  { %1562 = vtanh.f32 %v933_v46  ;;  %v936_v50 = vadd.f32 %v1328_v49, %v1941_v12  ;;  %v927_v51 = vpop.f32.mrb[31].mxu0 }
 0x32a   :  { %1564 = vtanh.f32 %v925_v48  ;;  %v928_v52 = vadd.f32 %v1941_v12, %v927_v51 }
 0x32b   :  { %v1555_v53 = vpop.eup %1554  ;;  %1566 = vtanh.f32 %v936_v50 }
 0x32c   :  { %v1557_v54 = vpop.eup %1556  ;;  %1045 = vst [vmem:[#allocation10 + $0x50] sm:$0xff] %v1555_v53  ;;  %1568 = vtanh.f32 %v928_v52 }
 0x32d   :  { %v1559_v55 = vpop.eup %1558  ;;  %1043 = vst [vmem:[#allocation10 + $0x40] sm:$0xff] %v1557_v54 }
 0x32e   :  { %v1561_v56 = vpop.eup %1560  ;;  %1046 = vst [vmem:[#allocation10 + $0x58] sm:$0xff] %v1559_v55  ;;  %v1331_v57 = vpop.f32.mrb[32].mxu0 }
 0x32f   :  { %1044 = vst [vmem:[#allocation10 + $0x48] sm:$0xff] %v1561_v56  ;;  %v949_v58 = vadd.f32 %v1331_v57, %v1941_v12  ;;  %v940_v59 = vpop.f32.mrb[33].mxu0 }
 0x330   :  { %v941_v60 = vadd.f32 %v1941_v12, %v940_v59  ;;  %v1332_v61 = vpop.f32.mrb[34].mxu0 }
 0x331   :  { %1570 = vtanh.f32 %v949_v58  ;;  %v952_v62 = vadd.f32 %v1332_v61, %v1941_v12  ;;  %v943_v63 = vpop.f32.mrb[35].mxu0 }
 0x332   :  { %1572 = vtanh.f32 %v941_v60  ;;  %v944_v0 = vadd.f32 %v1941_v12, %v943_v63 }
 0x333   :  { %v1563_v1 = vpop.eup %1562  ;;  %1574 = vtanh.f32 %v952_v62 }
 0x334   :  { %v1565_v2 = vpop.eup %1564  ;;  %1049 = vst [vmem:[#allocation10 + $0x70] sm:$0xff] %v1563_v1  ;;  %1576 = vtanh.f32 %v944_v0 }
 0x335   :  { %v1567_v3 = vpop.eup %1566  ;;  %1047 = vst [vmem:[#allocation10 + $0x60] sm:$0xff] %v1565_v2 }
 0x336   :  { %v1569_v4 = vpop.eup %1568  ;;  %1050 = vst [vmem:[#allocation10 + $0x78] sm:$0xff] %v1567_v3  ;;  %v1335_v5 = vpop.f32.mrb[36].mxu0 }
 0x337   :  { %1048 = vst [vmem:[#allocation10 + $0x68] sm:$0xff] %v1569_v4  ;;  %v965_v6 = vadd.f32 %v1335_v5, %v1941_v12  ;;  %v956_v7 = vpop.f32.mrb[37].mxu0 }
 0x338   :  { %v957_v8 = vadd.f32 %v1941_v12, %v956_v7  ;;  %v1336_v9 = vpop.f32.mrb[38].mxu0 }
 0x339   :  { %1578 = vtanh.f32 %v965_v6  ;;  %v968_v10 = vadd.f32 %v1336_v9, %v1941_v12  ;;  %v959_v11 = vpop.f32.mrb[39].mxu0 }
 0x33a   :  { %1580 = vtanh.f32 %v957_v8  ;;  %v960_v13 = vadd.f32 %v1941_v12, %v959_v11 }
 0x33b   :  { %v1571_v36 = vpop.eup %1570  ;;  %1582 = vtanh.f32 %v968_v10 }
 0x33c   :  { %v1573_v14 = vpop.eup %1572  ;;  %1053 = vst [vmem:[#allocation10 + $0x90] sm:$0xff] %v1571_v36  ;;  %1584 = vtanh.f32 %v960_v13 }
 0x33d   :  { %v1575_v15 = vpop.eup %1574  ;;  %1051 = vst [vmem:[#allocation10 + $0x80] sm:$0xff] %v1573_v14 }
 0x33e   :  { %v1577_v16 = vpop.eup %1576  ;;  %1054 = vst [vmem:[#allocation10 + $0x98] sm:$0xff] %v1575_v15  ;;  %v1339_v18 = vpop.f32.mrb[40].mxu0 }
 0x33f   :  { %1052 = vst [vmem:[#allocation10 + $0x88] sm:$0xff] %v1577_v16  ;;  %v981_v19 = vadd.f32 %v1339_v18, %v1941_v12  ;;  %v972_v20 = vpop.f32.mrb[41].mxu0 }
 0x340   :  { %v973_v22 = vadd.f32 %v1941_v12, %v972_v20  ;;  %v1340_v23 = vpop.f32.mrb[42].mxu0 }
 0x341   :  { %1586 = vtanh.f32 %v981_v19  ;;  %v984_v24 = vadd.f32 %v1340_v23, %v1941_v12  ;;  %v975_v25 = vpop.f32.mrb[43].mxu0 }
 0x342   :  { %1588 = vtanh.f32 %v973_v22  ;;  %v976_v27 = vadd.f32 %v1941_v12, %v975_v25 }
 0x343   :  { %v1579_v17 = vpop.eup %1578  ;;  %1590 = vtanh.f32 %v984_v24 }
 0x344   :  { %v1581_v21 = vpop.eup %1580  ;;  %1057 = vst [vmem:[#allocation10 + $0xb0] sm:$0xff] %v1579_v17  ;;  %1592 = vtanh.f32 %v976_v27 }
 0x345   :  { %v1583_v26 = vpop.eup %1582  ;;  %1055 = vst [vmem:[#allocation10 + $0xa0] sm:$0xff] %v1581_v21 }
 0x346   :  { %v1585_v28 = vpop.eup %1584  ;;  %1058 = vst [vmem:[#allocation10 + $0xb8] sm:$0xff] %v1583_v26  ;;  %v1343_v29 = vpop.f32.mrb[44].mxu0 }
 0x347   :  { %1056 = vst [vmem:[#allocation10 + $0xa8] sm:$0xff] %v1585_v28  ;;  %v997_v30 = vadd.f32 %v1343_v29, %v1941_v12  ;;  %v988_v31 = vpop.f32.mrb[45].mxu0 }
 0x348   :  { %v989_v32 = vadd.f32 %v1941_v12, %v988_v31  ;;  %v1344_v33 = vpop.f32.mrb[46].mxu0 }
 0x349   :  { %1594 = vtanh.f32 %v997_v30  ;;  %v1000_v34 = vadd.f32 %v1344_v33, %v1941_v12  ;;  %v991_v35 = vpop.f32.mrb[47].mxu0 }
 0x34a   :  { %1596 = vtanh.f32 %v989_v32  ;;  %v992_v37 = vadd.f32 %v1941_v12, %v991_v35 }
 0x34b   :  { %v1587_v38 = vpop.eup %1586  ;;  %1598 = vtanh.f32 %v1000_v34 }
 0x34c   :  { %v1589_v39 = vpop.eup %1588  ;;  %1061 = vst [vmem:[#allocation10 + $0xd0] sm:$0xff] %v1587_v38  ;;  %1600 = vtanh.f32 %v992_v37 }
 0x34d   :  { %v1591_v40 = vpop.eup %1590  ;;  %1059 = vst [vmem:[#allocation10 + $0xc0] sm:$0xff] %v1589_v39 }
 0x34e   :  { %v1593_v41 = vpop.eup %1592  ;;  %1062 = vst [vmem:[#allocation10 + $0xd8] sm:$0xff] %v1591_v40 }
 0x34f   :  { %1060 = vst [vmem:[#allocation10 + $0xc8] sm:$0xff] %v1593_v41 }
 0x353   :  { %v1595_v42 = vpop.eup %1594 }
 0x354   :  { %v1597_v43 = vpop.eup %1596  ;;  %1065 = vst [vmem:[#allocation10 + $0xf0] sm:$0xff] %v1595_v42 }
 0x355   :  { %v1599_v44 = vpop.eup %1598  ;;  %1063 = vst [vmem:[#allocation10 + $0xe0] sm:$0xff] %v1597_v43 }
 0x356   :  { %v1601_v45 = vpop.eup %1600  ;;  %1066 = vst [vmem:[#allocation10 + $0xf8] sm:$0xff] %v1599_v44 }
 0x357   :  { %1064 = vst [vmem:[#allocation10 + $0xe8] sm:$0xff] %v1601_v45 }
 0x358   :  { %1701 = shalt.err (!%p1698_p8)
}
 0x359   :  { %s1702_s9 = scalar_lea.hbm %s1994_s7, 4096 }
 0x35a   :  { %p1703_p9 = scmp.ne.s32.totalorder %s1994_s7, %s1702_s9  ;;  %p1706_p10 = scmp.lt.u32.totalorder %s1702_s9, %s1994_s7 }
 0x35c   :  { %p1708_p11 = pnand %p1706_p10, %p1703_p9 }
 0x35e   :  { %1711 = shalt.err (!%p1708_p11)
}
 0x35f   :  { %s1727_s16 = smov 128   ;;  %s1728_s0 = smov 8  }
 0x360   :  { %1078 = dma.vmem_to_hbm [thread:$0]  %s1073_s28, 4096, %s1994_s7, [#allocation4], %s1727_s16, %s1727_s16, %s1728_s0  }
 0x361   :  { %1718 = dma.done.wait [#allocation4], 4096  }
 0x362   :  { %1719 = vsyncadd [#allocation4], 4294963200 }
 0x363   :  { %1082 = vsyncpa [#allocation3], 1 }
 0x364   :  { %1083 = vsyncpa [#allocation6], 1 }
 0x365   :  { %1084 = vsyncpa [#allocation9], 1 }
 0x366   :  { %1085 = vsyncpa [#allocation4], 1 }

</bundles_post_ra>
